<compile_context>
chip_gen: v7x
topology: tpu7x:2x2x1
jax: 0.10.0
libtpu: 0.0.40
codegen_flags: <defaults>
</compile_context>

<pallas_src>
import functools

import jax
import jax.numpy as jnp
from jax.experimental import pallas as pl
from jax.experimental.pallas import tpu as pltpu

DENSE_FEATURES = 2208    # models.densenet161().classifier.in_features
EFF_FEATURES = 1280      # models.efficientnet_b0().classifier[1].in_features
HIDDEN = 512
NUM_CLASSES = 1
OUT_PAD = 128            # lane-dense padded output width (sliced back to NUM_CLASSES)
C_PAD = 128              # lane-padded channel/contraction width for the GAP scratch
DROPOUT_P = 0.4
LEAKY_SLOPE = 0.01       # nn.LeakyReLU() default negative_slope


def _round_up(x, m):
    return (x + m - 1) // m * m


# ---------------------------------------------------------------------------
# Fused kernel: GAP reduction + (folded) classifier head
# ---------------------------------------------------------------------------
def _fused_kernel(x_ref,                       # [c, bt, sc]      bf16
                  drop_ref,                    # [bt, HIDDEN]     f32 (pre-scaled keep mask)
                  wf_ref, bf_ref,              # [C_PAD, HIDDEN], [1, HIDDEN]   f32
                  w2_ref, b2_ref,              # [HIDDEN, OUT_PAD], [1, OUT_PAD] f32
                  o_ref,                       # [bt, OUT_PAD]    f32
                  gap_ref,                     # scratch VMEM [bt, C_PAD] f32
                  *, channels, inv_hw):
    # program ids only at the top level of the kernel (never inside pl.when)
    si = pl.program_id(1)
    ns = pl.num_programs(1)

    # ---- global average pool: accumulate partial spatial sums in f32 -------
    @pl.when(si == 0)
    def _():
        gap_ref[...] = jnp.zeros_like(gap_ref)

    # One cross-lane reduce per channel (c is tiny); channel ci lives in lane ci
    # of the scratch so the finalize matmul needs no in-kernel transpose.
    for ci in range(channels):
        col = jnp.sum(x_ref[ci].astype(jnp.float32), axis=-1, keepdims=True)  # [bt, 1]
        gap_ref[:, ci:ci + 1] += col

    # ---- finalize on the last spatial chunk: classifier head ---------------
    @pl.when(si == ns - 1)
    def _():
        # TODO(synk): full DenseNet161 / EfficientNet-B0 backbones (dense blocks,
        # MBConv, BatchNorm, SE, pretrained weights) are not translated; they are
        # stood in by GAP + learned projections which the wrapper folds (exactly,
        # affine∘affine) into the first classifier Linear.
        gap = gap_ref[...] * inv_hw                               # [bt, C_PAD]; lanes >= channels are 0

        # cat(dense, eff) @ W1 + b1 (projections folded): gap @ Wf + bf
        h = (jnp.dot(gap, wf_ref[...], preferred_element_type=jnp.float32)
             + bf_ref[...])                                       # [bt, HIDDEN]

        # LeakyReLU(negative_slope=0.01)
        h = jnp.where(h >= 0.0, h, LEAKY_SLOPE * h)

        # Dropout(p=0.4): pre-scaled keep mask (0 or 1/0.6); all-ones in eval.
        h = h * drop_ref[...]

        # Linear(512, num_classes), padded to a lane-dense 128-wide output.
        o_ref[...] = (jnp.dot(h, w2_ref[...], preferred_element_type=jnp.float32)
                      + b2_ref[...])


# ---------------------------------------------------------------------------
# Wrapper
# ---------------------------------------------------------------------------
def dense_efficient_net(x, params, *, seed=0, training=True,
                        batch_tile=128, max_spatial_chunk=4096):
    f32 = jnp.float32
    b, c, hh, ww = x.shape
    assert c <= C_PAD, "channel count must fit in the lane-padded GAP scratch"
    s_total = hh * ww

    # ---- batch tiling: >=2 tiles when b > 8 so v7x megacore can split ------
    nb_target = max(2 if b > 8 else 1, -(-b // batch_tile))
    bt = _round_up(-(-b // nb_target), 8)
    b_pad = _round_up(b, bt)
    nb = b_pad // bt

    # ---- spatial chunking (lane axis); zero-pad up to a 128-aligned chunk --
    sc_cap = max(128, (max_spatial_chunk // 128) * 128)
    sc = min(_round_up(s_total, 128), sc_cap)
    s_pad = _round_up(s_total, sc)
    ns = s_pad // sc

    # ---- input: bf16, channel-major (c, b, s); zero padding is exact for GAP
    # (inv_hw uses the true H*W).  TODO(synk): when b % bt != 0 this jnp.pad
    # materializes one extra copy of the activations; callers with large ragged
    # batches should pick a batch_tile that divides b.
    x3 = jnp.transpose(x.reshape(b, c, s_total), (1, 0, 2)).astype(jnp.bfloat16)
    if b_pad != b or s_pad != s_total:
        x3 = jnp.pad(x3, ((0, 0), (0, b_pad - b), (0, s_pad - s_total)))

    # ---- fold stub projections into the first Linear (exact: affine∘affine)
    w1d = params["w1_dense"].astype(f32)
    w1e = params["w1_eff"].astype(f32)
    w_fused = (params["w_dense_proj"].astype(f32) @ w1d
               + params["w_eff_proj"].astype(f32) @ w1e)          # [c, HIDDEN]
    b_fused = (params["b_dense_proj"].astype(f32) @ w1d
               + params["b_eff_proj"].astype(f32) @ w1e
               + params["b1"].astype(f32))                        # [1, HIDDEN]
    wf = jnp.zeros((C_PAD, HIDDEN), f32).at[:c, :].set(w_fused)   # K padded to 128
    w2p = jnp.zeros((HIDDEN, OUT_PAD), f32).at[:, :NUM_CLASSES].set(
        params["w2"].astype(f32))
    b2p = jnp.zeros((1, OUT_PAD), f32).at[:, :NUM_CLASSES].set(
        params["b2"].astype(f32))

    # ---- dropout keep mask, pre-scaled, generated portably on the host -----
    # (caller must vary `seed` per training step for fresh masks)
    if training:
        keep = jax.random.uniform(jax.random.PRNGKey(seed), (b_pad, HIDDEN), f32) >= DROPOUT_P
        drop = keep.astype(f32) * (1.0 / (1.0 - DROPOUT_P))
    else:
        drop = jnp.ones((b_pad, HIDDEN), f32)

    def resident(shape):
        # head weights stay VMEM-resident: same block index for every grid step
        return pl.BlockSpec(shape, lambda bi, si: (0, 0))

    out_padded = pl.pallas_call(
        functools.partial(_fused_kernel, channels=c, inv_hw=1.0 / float(s_total)),
        out_shape=jax.ShapeDtypeStruct((b_pad, OUT_PAD), f32),
        grid=(nb, ns),
        in_specs=[
            pl.BlockSpec((c, bt, sc), lambda bi, si: (0, bi, si)),
            pl.BlockSpec((bt, HIDDEN), lambda bi, si: (bi, 0)),
            resident((C_PAD, HIDDEN)),
            resident((1, HIDDEN)),
            resident((HIDDEN, OUT_PAD)),
            resident((1, OUT_PAD)),
        ],
        out_specs=pl.BlockSpec((bt, OUT_PAD), lambda bi, si: (bi, 0)),
        scratch_shapes=[pltpu.VMEM((bt, C_PAD), jnp.float32)],
        compiler_params=pltpu.CompilerParams(
            dimension_semantics=("parallel", "arbitrary"),
            vmem_limit_bytes=48 * 1024 * 1024),
    )(x3, drop, wf, b_fused, w2p, b2p)

    return out_padded[:b, :NUM_CLASSES]


# ---------------------------------------------------------------------------
# Deterministic parameter init (synthetic weights, shapes match the module)
# ---------------------------------------------------------------------------
def init_params(key, in_channels):
    ks = jax.random.split(key, 8)

    def u(k, shape, fan_in):
        bound = 1.0 / jnp.sqrt(jnp.float32(fan_in))
        return jax.random.uniform(k, shape, jnp.float32, -bound, bound)

    total = DENSE_FEATURES + EFF_FEATURES                             # 3488
    w1 = u(ks[4], (total, HIDDEN), total)                             # Linear(3488,512)
    return {
        "w_dense_proj": u(ks[0], (in_channels, DENSE_FEATURES), in_channels),
        "b_dense_proj": u(ks[1], (1, DENSE_FEATURES), in_channels),
        "w_eff_proj":   u(ks[2], (in_channels, EFF_FEATURES), in_channels),
        "b_eff_proj":   u(ks[3], (1, EFF_FEATURES), in_channels),
        "w1_dense":     w1[:DENSE_FEATURES],                          # [2208, 512]
        "w1_eff":       w1[DENSE_FEATURES:],                          # [1280, 512]
        "b1":           u(ks[5], (1, HIDDEN), total),
        "w2":           u(ks[6], (HIDDEN, NUM_CLASSES), HIDDEN),      # Linear(512,1)
        "b2":           u(ks[7], (1, NUM_CLASSES), HIDDEN),
    }


if __name__ == "__main__":
    key = jax.random.PRNGKey(0)
    kx, kp = jax.random.split(key)

    B, C, H, W = 2, 4, 16, 16                                         # small NCHW input
    x = jax.random.normal(kx, (B, C, H, W), dtype=jnp.float32)
    params = init_params(kp, C)

    # max_spatial_chunk=128 forces 2 spatial grid steps to exercise the
    # accumulate/finalize reduction path even at this toy size.
    out = dense_efficient_net(x, params, seed=0, training=True,
                              max_spatial_chunk=128)
    out = jax.block_until_ready(out)
    assert out.shape == (B, NUM_CLASSES) and out.dtype == jnp.float32
    assert bool(jnp.all(jnp.isfinite(out)))
    print("KERNEL_OK")
</pallas_src>

<mosaic_0001>
module attributes {stable_mosaic.version = 11 : i64} {
  func.func @_fused_kernel(%arg0: i32, %arg1: i32, %arg2: memref<4x8x128xbf16, #tpu.memory_space<vmem>>, %arg3: memref<8x512xf32, #tpu.memory_space<vmem>>, %arg4: memref<128x512xf32, #tpu.memory_space<vmem>>, %arg5: memref<1x512xf32, #tpu.memory_space<vmem>>, %arg6: memref<512x128xf32, #tpu.memory_space<vmem>>, %arg7: memref<1x128xf32, #tpu.memory_space<vmem>>, %arg8: memref<8x128xf32, #tpu.memory_space<vmem>>, %arg9: memref<8x128xf32, #tpu.memory_space<vmem>>) attributes {dimension_semantics = [#tpu.dimension_semantics<parallel>, #tpu.dimension_semantics<arbitrary>], iteration_bounds = array<i64: 1, 2>, scalar_prefetch = 0 : i64, scratch_operands = 1 : i64, tpu.core_type = #tpu.core_type<tc>, window_params = [{transform_indices = @transform_0, window_bounds = array<i64: 4, 8, 128>}, {transform_indices = @transform_1, window_bounds = array<i64: 8, 512>}, {pipeline_mode = #tpu.pipeline_mode<synchronous>, transform_indices = @transform_2, window_bounds = array<i64: 128, 512>}, {pipeline_mode = #tpu.pipeline_mode<synchronous>, transform_indices = @transform_3, window_bounds = array<i64: 1, 512>}, {pipeline_mode = #tpu.pipeline_mode<synchronous>, transform_indices = @transform_4, window_bounds = array<i64: 512, 128>}, {pipeline_mode = #tpu.pipeline_mode<synchronous>, transform_indices = @transform_5, window_bounds = array<i64: 1, 128>}, {transform_indices = @transform_6, window_bounds = array<i64: 8, 128>}]} {
    %c0_i32 = arith.constant 0 : i32
    %0 = arith.cmpi eq, %arg1, %c0_i32 : i32
    %1 = arith.extui %0 : i1 to i32
    %c0_i32_0 = arith.constant 0 : i32
    %2 = arith.cmpi ne, %1, %c0_i32_0 : i32
    scf.if %2 {
      %cst_29 = arith.constant 0.000000e+00 : f32
      %38 = vector.broadcast %cst_29 : f32 to vector<8x128xf32>
      %c0_30 = arith.constant 0 : index
      %c0_31 = arith.constant 0 : index
      %39 = vector.load %arg9[%c0_30, %c0_31] : memref<8x128xf32, #tpu.memory_space<vmem>>, vector<8x128xf32>
      tpu.vector_store %arg9[%c0_30, %c0_31], %38 {strides = array<i32>} : memref<8x128xf32, #tpu.memory_space<vmem>>, vector<8x128xf32>,
    } else {
    }
    %c0 = arith.constant 0 : index
    %c0_1 = arith.constant 0 : index
    %c0_2 = arith.constant 0 : index
    %3 = vector.load %arg2[%c0, %c0_1, %c0_2] : memref<4x8x128xbf16, #tpu.memory_space<vmem>>, vector<1x8x128xbf16>
    %4 = vector.shape_cast %3 : vector<1x8x128xbf16> to vector<8x128xbf16>
    %5 = arith.extf %4 : vector<8x128xbf16> to vector<8x128xf32>
    %cst = arith.constant dense<0.000000e+00> : vector<8xf32>
    %6 = vector.multi_reduction <add>, %5, %cst [1] : vector<8x128xf32> to vector<8xf32>
    %7 = vector.shape_cast %6 : vector<8xf32> to vector<8x1xf32>
    %c0_3 = arith.constant 0 : index
    %c0_4 = arith.constant 0 : index
    %8 = vector.load %arg9[%c0_3, %c0_4] : memref<8x128xf32, #tpu.memory_space<vmem>>, vector<8x1xf32>
    %9 = arith.addf %8, %7 : vector<8x1xf32>
    %c0_5 = arith.constant 0 : index
    %c0_6 = arith.constant 0 : index
    %10 = vector.load %arg9[%c0_5, %c0_6] : memref<8x128xf32, #tpu.memory_space<vmem>>, vector<8x1xf32>
    tpu.vector_store %arg9[%c0_5, %c0_6], %9 {strides = array<i32>} : memref<8x128xf32, #tpu.memory_space<vmem>>, vector<8x1xf32>,
    %c1 = arith.constant 1 : index
    %c0_7 = arith.constant 0 : index
    %c0_8 = arith.constant 0 : index
    %11 = vector.load %arg2[%c1, %c0_7, %c0_8] : memref<4x8x128xbf16, #tpu.memory_space<vmem>>, vector<1x8x128xbf16>
    %12 = vector.shape_cast %11 : vector<1x8x128xbf16> to vector<8x128xbf16>
    %13 = arith.extf %12 : vector<8x128xbf16> to vector<8x128xf32>
    %cst_9 = arith.constant dense<0.000000e+00> : vector<8xf32>
    %14 = vector.multi_reduction <add>, %13, %cst_9 [1] : vector<8x128xf32> to vector<8xf32>
    %15 = vector.shape_cast %14 : vector<8xf32> to vector<8x1xf32>
    %c0_10 = arith.constant 0 : index
    %c1_11 = arith.constant 1 : index
    %16 = vector.load %arg9[%c0_10, %c1_11] : memref<8x128xf32, #tpu.memory_space<vmem>>, vector<8x1xf32>
    %17 = arith.addf %16, %15 : vector<8x1xf32>
    %c0_12 = arith.constant 0 : index
    %c1_13 = arith.constant 1 : index
    %18 = vector.load %arg9[%c0_12, %c1_13] : memref<8x128xf32, #tpu.memory_space<vmem>>, vector<8x1xf32>
    tpu.vector_store %arg9[%c0_12, %c1_13], %17 {strides = array<i32>} : memref<8x128xf32, #tpu.memory_space<vmem>>, vector<8x1xf32>,
    %c2 = arith.constant 2 : index
    %c0_14 = arith.constant 0 : index
    %c0_15 = arith.constant 0 : index
    %19 = vector.load %arg2[%c2, %c0_14, %c0_15] : memref<4x8x128xbf16, #tpu.memory_space<vmem>>, vector<1x8x128xbf16>
    %20 = vector.shape_cast %19 : vector<1x8x128xbf16> to vector<8x128xbf16>
    %21 = arith.extf %20 : vector<8x128xbf16> to vector<8x128xf32>
    %cst_16 = arith.constant dense<0.000000e+00> : vector<8xf32>
    %22 = vector.multi_reduction <add>, %21, %cst_16 [1] : vector<8x128xf32> to vector<8xf32>
    %23 = vector.shape_cast %22 : vector<8xf32> to vector<8x1xf32>
    %c0_17 = arith.constant 0 : index
    %c2_18 = arith.constant 2 : index
    %24 = vector.load %arg9[%c0_17, %c2_18] : memref<8x128xf32, #tpu.memory_space<vmem>>, vector<8x1xf32>
    %25 = arith.addf %24, %23 : vector<8x1xf32>
    %c0_19 = arith.constant 0 : index
    %c2_20 = arith.constant 2 : index
    %26 = vector.load %arg9[%c0_19, %c2_20] : memref<8x128xf32, #tpu.memory_space<vmem>>, vector<8x1xf32>
    tpu.vector_store %arg9[%c0_19, %c2_20], %25 {strides = array<i32>} : memref<8x128xf32, #tpu.memory_space<vmem>>, vector<8x1xf32>,
    %c3 = arith.constant 3 : index
    %c0_21 = arith.constant 0 : index
    %c0_22 = arith.constant 0 : index
    %27 = vector.load %arg2[%c3, %c0_21, %c0_22] : memref<4x8x128xbf16, #tpu.memory_space<vmem>>, vector<1x8x128xbf16>
    %28 = vector.shape_cast %27 : vector<1x8x128xbf16> to vector<8x128xbf16>
    %29 = arith.extf %28 : vector<8x128xbf16> to vector<8x128xf32>
    %cst_23 = arith.constant dense<0.000000e+00> : vector<8xf32>
    %30 = vector.multi_reduction <add>, %29, %cst_23 [1] : vector<8x128xf32> to vector<8xf32>
    %31 = vector.shape_cast %30 : vector<8xf32> to vector<8x1xf32>
    %c0_24 = arith.constant 0 : index
    %c3_25 = arith.constant 3 : index
    %32 = vector.load %arg9[%c0_24, %c3_25] : memref<8x128xf32, #tpu.memory_space<vmem>>, vector<8x1xf32>
    %33 = arith.addf %32, %31 : vector<8x1xf32>
    %c0_26 = arith.constant 0 : index
    %c3_27 = arith.constant 3 : index
    %34 = vector.load %arg9[%c0_26, %c3_27] : memref<8x128xf32, #tpu.memory_space<vmem>>, vector<8x1xf32>
    tpu.vector_store %arg9[%c0_26, %c3_27], %33 {strides = array<i32>} : memref<8x128xf32, #tpu.memory_space<vmem>>, vector<8x1xf32>,
    %c1_i32 = arith.constant 1 : i32
    %35 = arith.cmpi eq, %arg1, %c1_i32 : i32
    %36 = arith.extui %35 : i1 to i32
    %c0_i32_28 = arith.constant 0 : i32
    %37 = arith.cmpi ne, %36, %c0_i32_28 : i32
    scf.if %37 {
      %c0_29 = arith.constant 0 : index
      %c0_30 = arith.constant 0 : index
      %38 = vector.load %arg9[%c0_29, %c0_30] : memref<8x128xf32, #tpu.memory_space<vmem>>, vector<8x128xf32>
      %cst_31 = arith.constant 3.906250e-03 : f32
      %39 = vector.broadcast %cst_31 : f32 to vector<8x128xf32>
      %40 = arith.mulf %38, %39 : vector<8x128xf32>
      %c0_32 = arith.constant 0 : index
      %c0_33 = arith.constant 0 : index
      %41 = vector.load %arg4[%c0_32, %c0_33] : memref<128x512xf32, #tpu.memory_space<vmem>>, vector<128x512xf32>
      %cst_34 = arith.constant dense<0.000000e+00> : vector<8x512xf32>
      %42 = tpu.matmul %40, %41, %cst_34 {dimension_numbers = #tpu.dot_dimension_numbers<[1], [0], [0], [1], [0, 0, 1, 1], [], []>} : vector<8x128xf32>, vector<128x512xf32>, vector<8x512xf32> -> vector<8x512xf32>
      %c0_35 = arith.constant 0 : index
      %c0_36 = arith.constant 0 : index
      %43 = vector.load %arg5[%c0_35, %c0_36] : memref<1x512xf32, #tpu.memory_space<vmem>>, vector<1x512xf32>
      %44 = vector.broadcast %43 : vector<1x512xf32> to vector<8x512xf32>
      %45 = arith.addf %42, %44 : vector<8x512xf32>
      %cst_37 = arith.constant 0.000000e+00 : f32
      %46 = vector.broadcast %cst_37 : f32 to vector<8x512xf32>
      %47 = arith.cmpf oge, %45, %46 : vector<8x512xf32>
      %cst_38 = arith.constant 0.00999999977 : f32
      %48 = vector.broadcast %cst_38 : f32 to vector<8x512xf32>
      %49 = arith.mulf %48, %45 : vector<8x512xf32>
      %50 = arith.select %47, %45, %49 : vector<8x512xi1>, vector<8x512xf32>
      %c0_39 = arith.constant 0 : index
      %c0_40 = arith.constant 0 : index
      %51 = vector.load %arg3[%c0_39, %c0_40] : memref<8x512xf32, #tpu.memory_space<vmem>>, vector<8x512xf32>
      %52 = arith.mulf %50, %51 : vector<8x512xf32>
      %c0_41 = arith.constant 0 : index
      %c0_42 = arith.constant 0 : index
      %53 = vector.load %arg6[%c0_41, %c0_42] : memref<512x128xf32, #tpu.memory_space<vmem>>, vector<512x128xf32>
      %cst_43 = arith.constant dense<0.000000e+00> : vector<8x128xf32>
      %54 = tpu.matmul %52, %53, %cst_43 {dimension_numbers = #tpu.dot_dimension_numbers<[1], [0], [0], [1], [0, 0, 1, 1], [], []>} : vector<8x512xf32>, vector<512x128xf32>, vector<8x128xf32> -> vector<8x128xf32>
      %c0_44 = arith.constant 0 : index
      %c0_45 = arith.constant 0 : index
      %55 = vector.load %arg7[%c0_44, %c0_45] : memref<1x128xf32, #tpu.memory_space<vmem>>, vector<1x128xf32>
      %56 = vector.broadcast %55 : vector<1x128xf32> to vector<8x128xf32>
      %57 = arith.addf %54, %56 : vector<8x128xf32>
      %c0_46 = arith.constant 0 : index
      %c0_47 = arith.constant 0 : index
      %58 = vector.load %arg8[%c0_46, %c0_47] : memref<8x128xf32, #tpu.memory_space<vmem>>, vector<8x128xf32>
      tpu.vector_store %arg8[%c0_46, %c0_47], %57 {strides = array<i32>} : memref<8x128xf32, #tpu.memory_space<vmem>>, vector<8x128xf32>,
    } else {
    }
    return
  }
  func.func @transform_0(%arg0: i32, %arg1: i32) -> (i32, i32, i32) {
    %c0_i32 = arith.constant 0 : i32
    %c0_i32_0 = arith.constant 0 : i32
    return %c0_i32, %arg0, %arg1 : i32, i32, i32
  }
  func.func @transform_1(%arg0: i32, %arg1: i32) -> (i32, i32) {
    %c0_i32 = arith.constant 0 : i32
    %c0_i32_0 = arith.constant 0 : i32
    return %arg0, %c0_i32 : i32, i32
  }
  func.func @transform_2(%arg0: i32, %arg1: i32) -> (i32, i32) {
    %c0_i32 = arith.constant 0 : i32
    %c0_i32_0 = arith.constant 0 : i32
    %c0_i32_1 = arith.constant 0 : i32
    return %c0_i32, %c0_i32_0 : i32, i32
  }
  func.func @transform_3(%arg0: i32, %arg1: i32) -> (i32, i32) {
    %c0_i32 = arith.constant 0 : i32
    %c0_i32_0 = arith.constant 0 : i32
    %c0_i32_1 = arith.constant 0 : i32
    return %c0_i32, %c0_i32_0 : i32, i32
  }
  func.func @transform_4(%arg0: i32, %arg1: i32) -> (i32, i32) {
    %c0_i32 = arith.constant 0 : i32
    %c0_i32_0 = arith.constant 0 : i32
    %c0_i32_1 = arith.constant 0 : i32
    return %c0_i32, %c0_i32_0 : i32, i32
  }
  func.func @transform_5(%arg0: i32, %arg1: i32) -> (i32, i32) {
    %c0_i32 = arith.constant 0 : i32
    %c0_i32_0 = arith.constant 0 : i32
    %c0_i32_1 = arith.constant 0 : i32
    return %c0_i32, %c0_i32_0 : i32, i32
  }
  func.func @transform_6(%arg0: i32, %arg1: i32) -> (i32, i32) {
    %c0_i32 = arith.constant 0 : i32
    %c0_i32_0 = arith.constant 0 : i32
    return %arg0, %c0_i32 : i32, i32
  }
}

</mosaic_0001>

<bundles_post_ra>
// kernel: tpu_custom_call.1
= control target key start
LH: loop header
LB: loop body
LE: loop exit
PB: predicated region body
PF: predicated region fallthrough
CT: control target
= control target key end

     0   :  { %s1760_s0 = inlined_call_operand.hbm [shape: bf16[4,8,256], index: 0, kind: input, shape index: {}]   ;;  %s1761_s1 = inlined_call_operand.hbm [shape: f32[8,512], index: 1, kind: input, shape index: {}]   ;;  %s1762_s2 = inlined_call_operand.hbm [shape: f32[128,512], index: 2, kind: input, shape index: {}]   ;;  %s1763_s3 = inlined_call_operand.vmem [shape: f32[1,512], index: 3, kind: input, shape index: {}]   ;;  %s1764_s4 = inlined_call_operand.hbm [shape: f32[512,128], index: 4, kind: input, shape index: {}]   ;;  %s1765_s5 = inlined_call_operand.vmem [shape: f32[1,128], index: 5, kind: input, shape index: {}]   ;;  %s1766_s6 = inlined_call_operand.hbm [shape: f32[8,128], index: 6, kind: output, shape index: {}]  }
   0x1   :  { %1773 = sst [smem:[#allocation16_spill]] %s1761_s1 }
   0x2   :  { %11 = vsyncpa [#allocation4], 0 }
   0x3   :  { %13 = vsyncpa [#allocation4 + $0x1], 0 }
   0x4   :  { %14 = vsyncpa [#allocation7], 0 }
   0x5   :  { %15 = vsyncpa [#allocation10], 0 }
   0x6   :  { %16 = vsyncpa [#allocation5], 0  ;;  %s1511_s21 = smov 0   ;;  %s1513_s22 = smov 0  }
   0x7   :  { %s1515_s23 = smov 0   ;;  %s1517_s24 = smov 0  }
   0x8   :  { %s1519_s25 = smov 0   ;;  %s1521_s26 = smov 0  }
   0x9 LB: > { %s1772_s27 = sadd.s32 4294967295, %s1461_s26   ;;  %p50_p0 = scmp.ne.s32.totalorder %s1449_s23, %s1445_s22  ;;  %s1461_s26 = sphi %s1521_s26, %s22_s26   ;;  %s1457_s25 = sphi %s1519_s25, %s1791_s25   ;;  %s1453_s24 = sphi %s1517_s24, %s1790_s24   ;;  %s1449_s23 = sphi %s1515_s23, %s1789_s23   ;;  %s1445_s22 = sphi %s1513_s22, %s1788_s22   ;;  %s1441_s21 = sphi %s1511_s21, %s1787_s21  }
   0xa   : > { %p51_p1 = scmp.eq.s32.totalorder %s1461_s26, 0  ;;  %p56_p2 = scmp.ne.s32.totalorder %s1445_s22, %s1441_s21 }
   0xb   : > { %p1546_p3 = scmp.eq.s32.totalorder %s1772_s27, 0  ;;  %p938_p4 = scmp.ge.s32.totalorder %s1461_s26, 1 }
   0xc   : > { %p52_p5 = por %p51_p1, %p50_p0  ;;  %p203_p6 = scmp.lt.s32.totalorder %s1461_s26, 3 }
   0xd   : > { %s1774_s28 = scalar_select %p1546_p3, 1, 0 }
   0xe   : > { %p1554_p7 = por %p1546_p3, %p56_p2  ;;  %p1558_p8 = pnand %p938_p4, %p203_p6 }
   0xf   : > { %s1463_s7 = smov [#allocation6]   ;;  %p1193_p10 = scmp.lt.s32.totalorder %s1461_s26, 2 }
  0x10   : > { %s1775_s29 = scalar_select %p1554_p7, 1, 0 }
  0x11   : > { %s1776_s30 = scalar_select %p1558_p8, 1, 0 }
  0x12   : > { %s219_s8 = sshll.u32 %s1463_s7, 4  ;;  %p1176_p9 = pneg %p1558_p8  ;;  %s220_s8 = int_to_ptr.vmem [resolvable:$true] %s219_s8 }
  0x13   : > { %s1464_s10 = smov [#allocation8]   ;;  %p1571_p12 = pnand %p1193_p10, %p52_p5 }
  0x14   : > { %p1567_p11 = pnand %p1176_p9, %p1546_p3  ;;  %s229_s11 = sshll.u32 %s1464_s10, 4  ;;  %s1575_s11 = int_to_ptr.vmem [resolvable:$true] %s229_s11 }
  0x15   : > { %s1778_s12 = scalar_select %p1571_p12, 1, 0 }
  0x16   : > { %s1779_s1 = sld [smem:[#allocation16_spill]]  ;;  %p1585_p0 = pneg %p1567_p11 }
  0x1c   : > { %s1259_s15 = scalar_lea.hbm %s1779_s1, 512 }
  0x1d   : > { %p1260_p13 = scmp.ne.s32.totalorder %s1779_s1, %s1259_s15  ;;  %p1266_p4 = scmp.lt.u32.totalorder %s1259_s15, %s1779_s1 }
  0x1f   : > { %p1262_p1 = pnand %p1585_p0, %p1260_p13 }
  0x21   : > { %p1263_p2 = pneg %p1262_p1 }
  0x23   : > { %p1268_p5 = pnand %p1266_p4, %p1263_p2 }
  0x25   : > { %1271 = shalt.err (!%p1268_p5)
}
  0x26   : > { %s1272_s21 = scalar_lea.vmem %s220_s8, 512  ;;  %p1280_p3 = scmp.lt.s32.totalorder %s220_s8, %s220_s8 }
  0x27   : > { %p1273_p6 = scmp.ne.s32.totalorder %s220_s8, %s1272_s21  ;;  %p1281_p7 = scmp.lt.s32.totalorder %s1272_s21, %s1272_s21 }
  0x29   : > { %p1275_p9 = pnand %p1273_p6, %p1585_p0  ;;  %p1282_p8 = por %p1281_p7, %p1280_p3 }
  0x2b   : > { %p1276_p10 = pneg %p1275_p9 }
  0x2d   : > { %p1283_p12 = pnand %p1282_p8, %p1276_p10 }
  0x2f   : > { %1286 = shalt.err (!%p1283_p12)
}
  0x30   : > { %1179 = dma.hbm_to_vmem [thread:$0]  (!%p1567_p11), %s1779_s1, 512, %s220_s8, [#allocation7]  }
  0x31   : > { %s1287_s15 = scalar_lea.hbm %s1762_s2, 8192 }
  0x32   : > { %p1288_p13 = scmp.ne.s32.totalorder %s1762_s2, %s1287_s15  ;;  %p1294_p7 = scmp.lt.u32.totalorder %s1287_s15, %s1762_s2 }
  0x34   : > { %p1290_p1 = pnand %p1288_p13, %p1585_p0 }
  0x36   : > { %p1291_p3 = pneg %p1290_p1 }
  0x38   : > { %p1296_p8 = pnand %p1294_p7, %p1291_p3 }
  0x3a   : > { %1299 = shalt.err (!%p1296_p8)
}
  0x3b   : > { %s1300_s8 = scalar_lea.vmem %s1575_s11, 8192  ;;  %p1308_p5 = scmp.lt.s32.totalorder %s1575_s11, %s1575_s11 }
  0x3c   : > { %p1301_p12 = scmp.ne.s32.totalorder %s1575_s11, %s1300_s8  ;;  %p1309_p6 = scmp.lt.s32.totalorder %s1300_s8, %s1300_s8 }
  0x3e   : > { %p1303_p2 = pnand %p1301_p12, %p1585_p0  ;;  %p1310_p9 = por %p1309_p6, %p1308_p5 }
  0x40   : > { %p1304_p4 = pneg %p1303_p2 }
  0x42   : > { %p1311_p10 = pnand %p1310_p9, %p1304_p4 }
  0x44   : > { %1314 = shalt.err (!%p1311_p10)
}
  0x45   : > { %s1465_s21 = smov 512   ;;  %s1466_s7 = smov 32  }
  0x46   : > { %1182 = dma.hbm_to_vmem [thread:$0]  (!%p1567_p11), %s1762_s2, 8192, %s1575_s11, [#allocation7], %s1465_s21, %s1465_s21, %s1466_s7  }
  0x47   : > { %s1467_s14 = smov [#allocation9]   ;;  %s1315_s19 = scalar_lea.hbm %s1764_s4, 8192 }
  0x48   : > { %s245_s15 = sshll.u32 %s1467_s14, 4  ;;  %p1316_p13 = scmp.ne.s32.totalorder %s1764_s4, %s1315_s19  ;;  %s246_s15 = int_to_ptr.vmem [resolvable:$true] %s245_s15 }
  0x49   : > { %p1322_p7 = scmp.lt.u32.totalorder %s1315_s19, %s1764_s4 }
  0x4a   : > { %p1318_p1 = pnand %p1316_p13, %p1585_p0 }
  0x4c   : > { %p1319_p3 = pneg %p1318_p1 }
  0x4e   : > { %p1324_p8 = pnand %p1322_p7, %p1319_p3 }
  0x50   : > { %1327 = shalt.err (!%p1324_p8)
}
  0x51   : > { %s1328_s11 = scalar_lea.vmem %s246_s15, 8192  ;;  %p1336_p5 = scmp.lt.s32.totalorder %s246_s15, %s246_s15 }
  0x52   : > { %p1329_p12 = scmp.ne.s32.totalorder %s246_s15, %s1328_s11  ;;  %p1337_p6 = scmp.lt.s32.totalorder %s1328_s11, %s1328_s11 }
  0x54   : > { %p1331_p2 = pnand %p1329_p12, %p1585_p0  ;;  %p1338_p9 = por %p1337_p6, %p1336_p5 }
  0x56   : > { %p1332_p4 = pneg %p1331_p2 }
  0x58   : > { %p1339_p10 = pnand %p1338_p9, %p1332_p4 }
  0x5a   : > { %1342 = shalt.err (!%p1339_p10)
}
  0x5b   : > { %s1468_s21 = smov 128   ;;  %s1469_s1 = smov 8  }
  0x5c   : > { %1185 = dma.hbm_to_vmem [thread:$0]  (!%p1567_p11), %s1764_s4, 8192, %s246_s15, [#allocation10], %s1468_s21, %s1468_s21, %s1469_s1  }
  0x5d   : > { %s43_s7 = sadd.s32 1, %s1449_s23  ;;  %s31_s10 = sadd.s32 1, %s1457_s25 }
  0x5e   : > { %s262_s13 = sand.u32 1, %s1449_s23   ;;  %p32_p0 = scmp.ge.s32.totalorder %s31_s10, 2 }
  0x5f   : > { %s943_s14 = sshll.u32 %s262_s13, 4  ;;  %s944_s16 = sshll.u32 %s1457_s25, 6 }
  0x60   : > { %s1793_s10 = smov (%p32_p0, %s31_s10), 0  ;;  %s1653_s9 = scalar_lea.hbm %s1760_s0, %s944_s16 }
  0x61   : > { %s39_s15 = ssub.s32 %s1457_s25, %s1793_s10  ;;  %s266_s20 = scalar_lea.vmem [#allocation3], %s943_s14 }
  0x62   : > { %s274_s8 = sshll.u32 %s266_s20, 4  ;;  %p41_p11 = scmp.eq.s32.totalorder %s39_s15, 0  ;;  %s1657_s8 = int_to_ptr.vmem [resolvable:$true] %s274_s8 }
  0x63   : > { %s1662_s1 = scalar_lea.sflag [#allocation4], %s262_s13  ;;  %s1343_s27 = scalar_lea.hbm %s1653_s9, 256 }
  0x64   : > { %s1660_s11 = scalar_select %p41_p11, %s1449_s23, %s43_s7  }
  0x65   : > { %p1344_p13 = scmp.ne.s32.totalorder %s1653_s9, %s1343_s27  ;;  %p1781_p1 = scmp.ne.s32.totalorder %s1778_s12, 0 }
  0x66   : > { %s1348_s14 = scalar_lea.hbm %s1760_s0, 512  ;;  %p1349_p12 = scmp.lt.u32.totalorder %s1653_s9, %s1760_s0 }
  0x67   : > { %p1345_p3 = pneg %p1781_p1  ;;  %p1350_p2 = scmp.lt.u32.totalorder %s1348_s14, %s1343_s27 }
  0x68   : > { %p1352_p5 = scmp.lt.u32.totalorder %s1343_s27, %s1653_s9 }
  0x69   : > { %p1346_p7 = pnand %p1345_p3, %p1344_p13  ;;  %p1351_p4 = por %p1350_p2, %p1349_p12 }
  0x6b   : > { %p1347_p8 = pneg %p1346_p7  ;;  %p1353_p6 = por %p1352_p5, %p1351_p4 }
  0x6d   : > { %p1354_p9 = pnand %p1353_p6, %p1347_p8 }
  0x6f   : > { %1357 = shalt.err (!%p1354_p9)
}
  0x70   : > { %s1358_s7 = scalar_lea.vmem %s1657_s8, 256  ;;  %s1470_s13 = smov [#allocation3]  }
  0x71   : > { %p1359_p10 = scmp.ne.s32.totalorder %s1657_s8, %s1358_s7  ;;  %s1363_s15 = sshll.u32 %s1470_s13, 4  ;;  %s1364_s15 = int_to_ptr.vmem [resolvable:$false] %s1363_s15 }
  0x72   : > { %s1365_s20 = scalar_lea.vmem %s1364_s15, 512  ;;  %p1366_p13 = scmp.lt.s32.totalorder %s1657_s8, %s1364_s15 }
  0x73   : > { %p1361_p0 = pnand %p1359_p10, %p1345_p3  ;;  %p1367_p7 = scmp.lt.s32.totalorder %s1365_s20, %s1358_s7 }
  0x75   : > { %p1362_p11 = pneg %p1361_p0  ;;  %p1368_p12 = por %p1367_p7, %p1366_p13 }
  0x77   : > { %p1369_p2 = pnand %p1368_p12, %p1362_p11 }
  0x79   : > { %1372 = shalt.err (!%p1369_p2)
}
  0x7a   : > { %s1471_s27 = smov 64   ;;  %s1472_s18 = smov 4  }
  0x7b   : > { %1189 = dma.hbm_to_vmem [thread:$0]  (!%p1781_p1), %s1653_s9, 256, %s1657_s8, %s1662_s1, %s1468_s21, %s1471_s27, %s1472_s18  }
  0x7c   : > { %p1782_p3 = scmp.ne.s32.totalorder %s1776_s30, 0 }
  0x7d   : > { %s288_s16 = sand.u32 (!%p1782_p3), 1, %s1445_s22   ;;  %p1783_p8 = scmp.ne.s32.totalorder (!%p1782_p3), %s1775_s29, 0 }
  0x7e   : > { %286 = sbr.rel (%p1782_p3) target bundleno = 808 (0x328), region = 44  ;;  %s946_s14 = sshll.u32 (!%p1782_p3), %s288_s16, 4 }
  0x7f   : > { %s289_s17 = scalar_lea.sflag (!%p1782_p3), [#allocation4], %s288_s16  ;;  %s292_s19 = scalar_lea.vmem (!%p1782_p3), [#allocation3], %s946_s14 }
  0x85   : > { %1424 = dma.done.wait (%p1783_p8), %s289_s17, 256  }
  0x86   : > { %1426 = vsyncadd (%p1783_p8), %s289_s17, 4294967040  ;;  %p1784_p4 = scmp.ne.s32.totalorder %s1774_s28, 0 }
  0x88   : > { %1428 = dma.done.wait (%p1784_p4), [#allocation7], 8704  }
  0x89   : > { %1430 = vsyncadd (%p1784_p4), [#allocation7], 4294958592 }
  0x8a   : > { %1432 = dma.done.wait (%p1784_p4), [#allocation10], 8192  }
  0x8b   : > { %1434 = vsyncadd (%p1784_p4), [#allocation10], 4294959104  ;;  %p950_p1 = scmp.ne.s32.totalorder %s1453_s24, 0 }
  0x8c   : > { %v1473_v0 = vmov (!%p950_p1), 0.0  }
  0x8d   : > { %331 = sbr.rel (%p950_p1) target bundleno = 148 (0x94), region = 64  ;;  %332 = vst [vmem:[#allocation2] sm:$0xff] (!%p950_p1), %v1473_v0 }
  0x94 PF: > { %v333_v1 = vld [vmem:[%s292_s19] sm:$0xff]   ;;  %v952_v2 = vld [vmem:[%s292_s19 + $0x8] sm:$0xff]   ;;  %vm339_vm0 = vcmask 7168   ;;  %vm348_vm1 = vcmask 15368   ;;  %vm357_vm2 = vcmask 23568   ;;  %vm366_vm3 = vcmask 31768  }
  0x95   : > { %v334_v3 = vunpack.c.l.bf16 %v333_v1  ;;  %v352_v4 = vunpack.c.l.bf16 %v952_v2  ;;  %v343_v5 = vunpack.c.h.bf16 %v333_v1  ;;  %v361_v6 = vunpack.c.h.bf16 %v952_v2  ;;  %v337_v7 = vld [vmem:[#allocation2] sm:$0xff]  ;;  %p954_p5 = scmp.ne.s32.totalorder %s1453_s24, 1 }
  0x96   : > { %v375_v19 = vld [vmem:[#allocation8 + $0x8] sm:$0xff] (!%p954_p5)  ;;  %v377_v21 = vld [vmem:[#allocation8 + $0x18] sm:$0xff] (!%p954_p5)  ;;  %v374_v24 = vld [vmem:[#allocation8] sm:$0xff] (!%p954_p5)  ;;  %v1474_v26 = vmov (!%p954_p5), 0.0  }
  0x97   : > { %335 = vadd.xlane.f32.xlu0 %v334_v3  ;;  %353 = vadd.xlane.f32.xlu1 %v352_v4  ;;  %v379_v20 = vld [vmem:[#allocation8 + $0x28] sm:$0xff] (!%p954_p5)  ;;  %v381_v23 = vld [vmem:[#allocation8 + $0x38] sm:$0xff] (!%p954_p5)  ;;  %v378_v25 = vld [vmem:[#allocation8 + $0x20] sm:$0xff] (!%p954_p5) }
  0x98   : > { %v1030_v22 = vpack.c.bf16 (!%p954_p5), %v379_v20, %v375_v19  ;;  %524 = vmatprep.mubr.f32.mxu0 (!%p954_p5), %v1474_v26  ;;  %595 = vmatprep.mubr.f32.mxu1 (!%p954_p5), %v1474_v26  ;;  %v1062_v27 = vpack.c.bf16 (!%p954_p5), %v381_v23, %v377_v21  ;;  %v1032_v28 = vpack.c.bf16 (!%p954_p5), %v378_v25, %v374_v24  ;;  %v376_v29 = vld [vmem:[#allocation8 + $0x10] sm:$0xff] (!%p954_p5)  ;;  %v383_v31 = vld [vmem:[#allocation8 + $0x48] sm:$0xff] (!%p954_p5)  ;;  %v385_v34 = vld [vmem:[#allocation8 + $0x58] sm:$0xff] (!%p954_p5) }
  0x99   : > { %v380_v30 = vld [vmem:[#allocation8 + $0x30] sm:$0xff] (!%p954_p5)  ;;  %v387_v33 = vld [vmem:[#allocation8 + $0x68] sm:$0xff] (!%p954_p5)  ;;  %v389_v35 = vld [vmem:[#allocation8 + $0x78] sm:$0xff] (!%p954_p5) }
  0x9a   : > { %1031 = vmatprep.subr.bf16.mxu0 (!%p954_p5), %v1030_v22  ;;  %v1064_v32 = vpack.c.bf16 (!%p954_p5), %v380_v30, %v376_v29  ;;  %1063 = vmatprep.subr.bf16.mxu1 (!%p954_p5), %v1062_v27  ;;  %v1034_v36 = vpack.c.bf16 (!%p954_p5), %v387_v33, %v383_v31  ;;  %v1066_v37 = vpack.c.bf16 (!%p954_p5), %v389_v35, %v385_v34  ;;  %v382_v38 = vld [vmem:[#allocation8 + $0x40] sm:$0xff] (!%p954_p5)  ;;  %v384_v40 = vld [vmem:[#allocation8 + $0x50] sm:$0xff] (!%p954_p5)  ;;  %v391_v43 = vld [vmem:[#allocation8 + $0x88] sm:$0xff] (!%p954_p5) }
  0x9b   : > { %344 = vadd.xlane.f32.xlu0 %v343_v5  ;;  %362 = vadd.xlane.f32.xlu1 %v361_v6  ;;  %v386_v39 = vld [vmem:[#allocation8 + $0x60] sm:$0xff] (!%p954_p5)  ;;  %v388_v42 = vld [vmem:[#allocation8 + $0x70] sm:$0xff] (!%p954_p5)  ;;  %v395_v44 = vld [vmem:[#allocation8 + $0xa8] sm:$0xff] (!%p954_p5) }
  0x9c   : > { %1033 = vmatpush1.bf16.msra.mxu0 (!%p954_p5), %v1032_v28  ;;  %1065 = vmatpush1.bf16.msra.mxu1 (!%p954_p5), %v1064_v32  ;;  %v1036_v41 = vpack.c.bf16 (!%p954_p5), %v386_v39, %v382_v38  ;;  %v1068_v45 = vpack.c.bf16 (!%p954_p5), %v388_v42, %v384_v40  ;;  %v1038_v46 = vpack.c.bf16 (!%p954_p5), %v395_v44, %v391_v43  ;;  %v393_v47 = vld [vmem:[#allocation8 + $0x98] sm:$0xff] (!%p954_p5)  ;;  %v390_v49 = vld [vmem:[#allocation8 + $0x80] sm:$0xff] (!%p954_p5)  ;;  %v392_v52 = vld [vmem:[#allocation8 + $0x90] sm:$0xff] (!%p954_p5) }
  0x9d   : > { %1035 = vmatprep.subr.bf16.mxu0 (!%p954_p5), %v1034_v36  ;;  %1067 = vmatprep.subr.bf16.mxu1 (!%p954_p5), %v1066_v37  ;;  %v397_v48 = vld [vmem:[#allocation8 + $0xb8] sm:$0xff] (!%p954_p5)  ;;  %v394_v51 = vld [vmem:[#allocation8 + $0xa0] sm:$0xff] (!%p954_p5)  ;;  %v396_v53 = vld [vmem:[#allocation8 + $0xb0] sm:$0xff] (!%p954_p5) }
  0x9e   : > { %v1070_v50 = vpack.c.bf16 (!%p954_p5), %v397_v48, %v393_v47  ;;  %v1040_v54 = vpack.c.bf16 (!%p954_p5), %v394_v51, %v390_v49  ;;  %v399_v55 = vld [vmem:[#allocation8 + $0xc8] sm:$0xff] (!%p954_p5)  ;;  %v401_v57 = vld [vmem:[#allocation8 + $0xd8] sm:$0xff] (!%p954_p5)  ;;  %v1072_v58 = vpack.c.bf16 (!%p954_p5), %v396_v53, %v392_v52  ;;  %v398_v61 = vld [vmem:[#allocation8 + $0xc0] sm:$0xff] (!%p954_p5) }
  0x9f   : > { %v403_v56 = vld [vmem:[#allocation8 + $0xe8] sm:$0xff] (!%p954_p5)  ;;  %v405_v60 = vld [vmem:[#allocation8 + $0xf8] sm:$0xff] (!%p954_p5)  ;;  %v402_v62 = vld [vmem:[#allocation8 + $0xe0] sm:$0xff] (!%p954_p5) }
  0xa0   : > { %1037 = vmatpush1.bf16.msra.mxu0 (!%p954_p5), %v1036_v41  ;;  %1069 = vmatpush1.bf16.msra.mxu1 (!%p954_p5), %v1068_v45  ;;  %v1042_v59 = vpack.c.bf16 (!%p954_p5), %v403_v56, %v399_v55  ;;  %v1074_v63 = vpack.c.bf16 (!%p954_p5), %v405_v60, %v401_v57  ;;  %v400_v0 = vld [vmem:[#allocation8 + $0xd0] sm:$0xff] (!%p954_p5)  ;;  %v407_v2 = vld [vmem:[#allocation8 + $0x108] sm:$0xff] (!%p954_p5)  ;;  %v409_v4 = vld [vmem:[#allocation8 + $0x118] sm:$0xff] (!%p954_p5)  ;;  %v1044_v6 = vpack.c.bf16 (!%p954_p5), %v402_v62, %v398_v61 }
  0xa1   : > { %1039 = vmatprep.subr.bf16.mxu0 (!%p954_p5), %v1038_v46  ;;  %1071 = vmatprep.subr.bf16.mxu1 (!%p954_p5), %v1070_v50  ;;  %v404_v1 = vld [vmem:[#allocation8 + $0xf0] sm:$0xff] (!%p954_p5)  ;;  %v411_v3 = vld [vmem:[#allocation8 + $0x128] sm:$0xff] (!%p954_p5)  ;;  %v413_v5 = vld [vmem:[#allocation8 + $0x138] sm:$0xff] (!%p954_p5) }
  0xa2   : > { %v414_v21 = vld [vmem:[#allocation8 + $0x140] sm:$0xff] (!%p954_p5)  ;;  %v416_v23 = vld [vmem:[#allocation8 + $0x150] sm:$0xff] (!%p954_p5)  ;;  %v423_v26 = vld [vmem:[#allocation8 + $0x188] sm:$0xff] (!%p954_p5) }
  0xa3   : > { %v418_v22 = vld [vmem:[#allocation8 + $0x160] sm:$0xff] (!%p954_p5)  ;;  %v420_v25 = vld [vmem:[#allocation8 + $0x170] sm:$0xff] (!%p954_p5)  ;;  %v427_v27 = vld [vmem:[#allocation8 + $0x1a8] sm:$0xff] (!%p954_p5) }
  0xa4   : > { %1041 = vmatpush1.bf16.msra.mxu0 (!%p954_p5), %v1040_v54  ;;  %1073 = vmatpush1.bf16.msra.mxu1 (!%p954_p5), %v1072_v58  ;;  %v425_v28 = vld [vmem:[#allocation8 + $0x198] sm:$0xff] (!%p954_p5)  ;;  %v1052_v30 = vpack.c.bf16 (!%p954_p5), %v418_v22, %v414_v21  ;;  %v1084_v31 = vpack.c.bf16 (!%p954_p5), %v420_v25, %v416_v23  ;;  %v1054_v32 = vpack.c.bf16 (!%p954_p5), %v427_v27, %v423_v26  ;;  %v422_v33 = vld [vmem:[#allocation8 + $0x180] sm:$0xff] (!%p954_p5)  ;;  %v424_v35 = vld [vmem:[#allocation8 + $0x190] sm:$0xff] (!%p954_p5) }
  0xa5   : > { %1043 = vmatprep.subr.bf16.mxu0 (!%p954_p5), %v1042_v59  ;;  %1075 = vmatprep.subr.bf16.mxu1 (!%p954_p5), %v1074_v63  ;;  %v429_v29 = vld [vmem:[#allocation8 + $0x1b8] sm:$0xff] (!%p954_p5)  ;;  %v426_v34 = vld [vmem:[#allocation8 + $0x1a0] sm:$0xff] (!%p954_p5)  ;;  %v428_v37 = vld [vmem:[#allocation8 + $0x1b0] sm:$0xff] (!%p954_p5) }
  0xa6   : > { %v1086_v36 = vpack.c.bf16 (!%p954_p5), %v429_v29, %v425_v28  ;;  %v431_v38 = vld [vmem:[#allocation8 + $0x1c8] sm:$0xff] (!%p954_p5)  ;;  %v433_v40 = vld [vmem:[#allocation8 + $0x1d8] sm:$0xff] (!%p954_p5)  ;;  %v1056_v42 = vpack.c.bf16 (!%p954_p5), %v426_v34, %v422_v33  ;;  %v1088_v43 = vpack.c.bf16 (!%p954_p5), %v428_v37, %v424_v35  ;;  %v430_v45 = vld [vmem:[#allocation8 + $0x1c0] sm:$0xff] (!%p954_p5) }
  0xa7   : > { %v435_v39 = vld [vmem:[#allocation8 + $0x1e8] sm:$0xff] (!%p954_p5)  ;;  %v437_v41 = vld [vmem:[#allocation8 + $0x1f8] sm:$0xff] (!%p954_p5)  ;;  %v434_v46 = vld [vmem:[#allocation8 + $0x1e0] sm:$0xff] (!%p954_p5) }
  0xa8   : > { %1045 = vmatpush1.bf16.msra.mxu0 (!%p954_p5), %v1044_v6  ;;  %v1058_v44 = vpack.c.bf16 (!%p954_p5), %v435_v39, %v431_v38  ;;  %v432_v47 = vld [vmem:[#allocation8 + $0x1d0] sm:$0xff] (!%p954_p5)  ;;  %v1090_v48 = vpack.c.bf16 (!%p954_p5), %v437_v41, %v433_v40  ;;  %v638_v50 = vld [vmem:[#allocation9 + $0x80] sm:$0xff] (!%p954_p5)  ;;  %v639_v51 = vld [vmem:[#allocation9 + $0x88] sm:$0xff] (!%p954_p5)  ;;  %v1060_v54 = vpack.c.bf16 (!%p954_p5), %v434_v46, %v430_v45 }
  0xa9   : > { %v436_v49 = vld [vmem:[#allocation8 + $0x1f0] sm:$0xff] (!%p954_p5)  ;;  %v670_v52 = vld [vmem:[#allocation9 + $0x180] sm:$0xff] (!%p954_p5)  ;;  %v671_v53 = vld [vmem:[#allocation9 + $0x188] sm:$0xff] (!%p954_p5)  ;;  %v1094_v57 = vpack.c.bf16 (!%p954_p5), %v639_v51, %v638_v50 }
  0xaa   : > { %v1092_v56 = vpack.c.bf16 (!%p954_p5), %v436_v49, %v432_v47  ;;  %v622_v58 = vld [vmem:[#allocation9] sm:$0xff] (!%p954_p5)  ;;  %v623_v59 = vld [vmem:[#allocation9 + $0x8] sm:$0xff] (!%p954_p5)  ;;  %v1126_v61 = vpack.c.bf16 (!%p954_p5), %v671_v53, %v670_v52  ;;  %v640_v63 = vld [vmem:[#allocation9 + $0x90] sm:$0xff] (!%p954_p5) }
  0xab   : > { %v654_v60 = vld [vmem:[#allocation9 + $0x100] sm:$0xff] (!%p954_p5)  ;;  %v655_v62 = vld [vmem:[#allocation9 + $0x108] sm:$0xff] (!%p954_p5)  ;;  %v645_v25 = vld [vmem:[#allocation9 + $0xb8] sm:$0xff] (!%p954_p5) }
  0xac   : > { %v658_v21 = vld [vmem:[#allocation9 + $0x120] sm:$0xff] (!%p954_p5)  ;;  %v659_v23 = vld [vmem:[#allocation9 + $0x128] sm:$0xff] (!%p954_p5)  ;;  %v676_v26 = vld [vmem:[#allocation9 + $0x1b0] sm:$0xff] (!%p954_p5) }
  0xad   : > { %v677_v27 = vld [vmem:[#allocation9 + $0x1b8] sm:$0xff] (!%p954_p5)  ;;  %v1136_v29 = vpack.c.bf16 (!%p954_p5), %v659_v23, %v658_v21  ;;  %v660_v33 = vld [vmem:[#allocation9 + $0x130] sm:$0xff] (!%p954_p5)  ;;  %v647_v37 = vld [vmem:[#allocation9 + $0xc8] sm:$0xff] (!%p954_p5) }
  0xae   : > { %v1138_v34 = vpack.c.bf16 (!%p954_p5), %v677_v27, %v676_v26  ;;  %v661_v35 = vld [vmem:[#allocation9 + $0x138] sm:$0xff] (!%p954_p5)  ;;  %v678_v38 = vld [vmem:[#allocation9 + $0x1c0] sm:$0xff] (!%p954_p5)  ;;  %v679_v39 = vld [vmem:[#allocation9 + $0x1c8] sm:$0xff] (!%p954_p5) }
  0xaf   : > { %v1140_v41 = vpack.c.bf16 (!%p954_p5), %v661_v35, %v660_v33  ;;  %v662_v45 = vld [vmem:[#allocation9 + $0x140] sm:$0xff] (!%p954_p5)  ;;  %v1142_v46 = vpack.c.bf16 (!%p954_p5), %v679_v39, %v678_v38  ;;  %v663_v47 = vld [vmem:[#allocation9 + $0x148] sm:$0xff] (!%p954_p5)  ;;  %v649_v49 = vld [vmem:[#allocation9 + $0xd8] sm:$0xff] (!%p954_p5) }
  0xb0   : > { %v680_v50 = vld [vmem:[#allocation9 + $0x1d0] sm:$0xff] (!%p954_p5)  ;;  %v681_v51 = vld [vmem:[#allocation9 + $0x1d8] sm:$0xff] (!%p954_p5)  ;;  %v1144_v53 = vpack.c.bf16 (!%p954_p5), %v663_v47, %v662_v45 }
 0x124   : > { %v336_v8 = vpop.xlane.xlu0 %335  ;;  %v354_v13 = vpop.xlane.xlu1 %353 }
 0x125   : > { %v338_v9 = vadd.f32 %v337_v7, %v336_v8  ;;  %v1076_v7 = vpack.c.bf16 (!%p954_p5), %v404_v1, %v400_v0  ;;  %v1046_v8 = vpack.c.bf16 (!%p954_p5), %v411_v3, %v407_v2  ;;  %v641_v0 = vld [vmem:[#allocation9 + $0x98] sm:$0xff] (!%p954_p5)  ;;  %v672_v2 = vld [vmem:[#allocation9 + $0x190] sm:$0xff] (!%p954_p5) }
 0x126   : > { %v673_v3 = vld [vmem:[#allocation9 + $0x198] sm:$0xff] (!%p954_p5)  ;;  %v1098_v6 = vpack.c.bf16 (!%p954_p5), %v641_v0, %v640_v63  ;;  %v651_v63 = vld [vmem:[#allocation9 + $0xe8] sm:$0xff] (!%p954_p5)  ;;  %v682_v0 = vld [vmem:[#allocation9 + $0x1e0] sm:$0xff] (!%p954_p5) }
 0x127   : > { %340 = vst.msk [vmem:[#allocation2] sm:$0xff] %vm339_vm0, %v338_v9  ;;  %v406_v9 = vld [vmem:[#allocation8 + $0x100] sm:$0xff] (!%p954_p5)  ;;  %1077 = vmatpush1.bf16.msra.mxu1 (!%p954_p5), %v1076_v7  ;;  %1047 = vmatprep.subr.bf16.mxu0 (!%p954_p5), %v1046_v8  ;;  %v624_v7 = vld [vmem:[#allocation9 + $0x10] sm:$0xff] (!%p954_p5)  ;;  %v625_v8 = vld [vmem:[#allocation9 + $0x18] sm:$0xff] (!%p954_p5) }
 0x128   : > { %v345_v10 = vpop.xlane.xlu0 %344  ;;  %v363_v16 = vpop.xlane.xlu1 %362 }
 0x12e   : > { %v346_v11 = vld [vmem:[#allocation2] sm:$0xff] }
 0x12f   : > { %v347_v12 = vadd.f32 %v346_v11, %v345_v10  ;;  %v410_v10 = vld [vmem:[#allocation8 + $0x120] sm:$0xff] (!%p954_p5)  ;;  %v408_v11 = vld [vmem:[#allocation8 + $0x110] sm:$0xff] (!%p954_p5) }
 0x131   : > { %349 = vst.msk [vmem:[#allocation2] sm:$0xff] %vm348_vm1, %v347_v12  ;;  %v1078_v12 = vpack.c.bf16 (!%p954_p5), %v413_v5, %v409_v4  ;;  %v1096_v4 = vpack.c.bf16 (!%p954_p5), %v623_v59, %v622_v58  ;;  %v1128_v5 = vpack.c.bf16 (!%p954_p5), %v655_v62, %v654_v60  ;;  %v664_v58 = vld [vmem:[#allocation9 + $0x150] sm:$0xff] (!%p954_p5)  ;;  %v665_v59 = vld [vmem:[#allocation9 + $0x158] sm:$0xff] (!%p954_p5)  ;;  %v650_v62 = vld [vmem:[#allocation9 + $0xe0] sm:$0xff] (!%p954_p5) }
 0x133   : > { %1079 = vmatprep.subr.bf16.mxu1 (!%p954_p5), %v1078_v12  ;;  %v642_v12 = vld [vmem:[#allocation9 + $0xa0] sm:$0xff] (!%p954_p5) }
 0x138   : > { %v355_v14 = vld [vmem:[#allocation2] sm:$0xff] }
 0x139   : > { %v356_v15 = vadd.f32 %v355_v14, %v354_v13  ;;  %v412_v13 = vld [vmem:[#allocation8 + $0x130] sm:$0xff] (!%p954_p5)  ;;  %v415_v14 = vld [vmem:[#allocation8 + $0x148] sm:$0xff] (!%p954_p5) }
 0x13a   : > { %v1080_v19 = vpack.c.bf16 (!%p954_p5), %v412_v13, %v408_v11  ;;  %v657_v11 = vld [vmem:[#allocation9 + $0x118] sm:$0xff] (!%p954_p5)  ;;  %v643_v13 = vld [vmem:[#allocation9 + $0xa8] sm:$0xff] (!%p954_p5) }
 0x13b   : > { %358 = vst.msk [vmem:[#allocation2] sm:$0xff] %vm357_vm2, %v356_v15  ;;  %v419_v15 = vld [vmem:[#allocation8 + $0x168] sm:$0xff] (!%p954_p5) }
 0x13c   : > { %v1050_v20 = vpack.c.bf16 (!%p954_p5), %v419_v15, %v415_v14  ;;  %1081 = vmatpush1.bf16.msra.mxu1 (!%p954_p5), %v1080_v19  ;;  %v674_v14 = vld [vmem:[#allocation9 + $0x1a0] sm:$0xff] (!%p954_p5)  ;;  %v675_v15 = vld [vmem:[#allocation9 + $0x1a8] sm:$0xff] (!%p954_p5) }
 0x13d   : > { %v626_v19 = vld [vmem:[#allocation9 + $0x20] sm:$0xff] (!%p954_p5)  ;;  %v1134_v22 = vpack.c.bf16 (!%p954_p5), %v675_v15, %v674_v14  ;;  %v685_v14 = vld [vmem:[#allocation9 + $0x1f8] sm:$0xff] (!%p954_p5)  ;;  %v636_v15 = vld [vmem:[#allocation9 + $0x70] sm:$0xff] (!%p954_p5) }
 0x13f   : > { %371 = sbr.rel (%p954_p5) target bundleno = 783 (0x30f), region = 68 }
 0x142   : > { %v364_v17 = vld [vmem:[#allocation2] sm:$0xff] }
 0x143   : > { %v365_v18 = vadd.f32 %v364_v17, %v363_v16  ;;  %v417_v16 = vld [vmem:[#allocation8 + $0x158] sm:$0xff] (!%p954_p5) }
 0x144   : > { %v421_v17 = vld [vmem:[#allocation8 + $0x178] sm:$0xff] (!%p954_p5) }
 0x145   : > { %367 = vst.msk [vmem:[#allocation2] sm:$0xff] %vm366_vm3, %v365_v18  ;;  %v1048_v18 = vpack.c.bf16 (!%p954_p5), %v410_v10, %v406_v9  ;;  %v1082_v24 = vpack.c.bf16 (!%p954_p5), %v421_v17, %v417_v16  ;;  %v656_v9 = vld [vmem:[#allocation9 + $0x110] sm:$0xff] (!%p954_p5)  ;;  %v1130_v10 = vpack.c.bf16 (!%p954_p5), %v673_v3, %v672_v2  ;;  %v1100_v16 = vpack.c.bf16 (!%p954_p5), %v625_v8, %v624_v7  ;;  %v683_v2 = vld [vmem:[#allocation9 + $0x1e8] sm:$0xff] (!%p954_p5)  ;;  %v634_v3 = vld [vmem:[#allocation9 + $0x60] sm:$0xff] (!%p954_p5) }
 0x146   : > { %v1132_v17 = vpack.c.bf16 %v657_v11, %v656_v9  ;;  %v666_v7 = vld [vmem:[#allocation9 + $0x160] sm:$0xff]  ;;  %v667_v8 = vld [vmem:[#allocation9 + $0x168] sm:$0xff]  ;;  %v653_v11 = vld [vmem:[#allocation9 + $0xf8] sm:$0xff] }
 0x147   : > { %1049 = vmatpush1.bf16.msra.mxu0 %v1048_v18  ;;  %1083 = vmatprep.subr.bf16.mxu1 %v1082_v24  ;;  %v1102_v18 = vpack.c.bf16 %v643_v13, %v642_v12  ;;  %v644_v24 = vld [vmem:[#allocation9 + $0xb0] sm:$0xff]  ;;  %v1152_v9 = vpack.c.bf16 %v667_v8, %v666_v7 }
 0x148   : > { %1051 = vmatprep.subr.bf16.mxu0 %v1050_v20  ;;  %1085 = vmatpush1.bf16.msra.mxu1 %v1084_v31  ;;  %v627_v20 = vld [vmem:[#allocation9 + $0x28] sm:$0xff]  ;;  %v628_v31 = vld [vmem:[#allocation9 + $0x30] sm:$0xff] }
 0x149   : > { %1087 = vmatprep.subr.bf16.mxu1 %v1086_v36  ;;  %v1104_v28 = vpack.c.bf16 %v627_v20, %v626_v19  ;;  %v646_v36 = vld [vmem:[#allocation9 + $0xc0] sm:$0xff]  ;;  %v684_v12 = vld [vmem:[#allocation9 + $0x1f0] sm:$0xff]  ;;  %v669_v20 = vld [vmem:[#allocation9 + $0x178] sm:$0xff] }
 0x14b   : > { %1053 = vmatpush1.bf16.msra.mxu0 %v1052_v30  ;;  %v1106_v30 = vpack.c.bf16 %v645_v25, %v644_v24  ;;  %v438_v25 = vld [vmem:[%s1763_s3] sm:$0xf] }
 0x14c   : > { %1055 = vmatprep.subr.bf16.mxu0 %v1054_v32  ;;  %v372_v55 = vld [vmem:[#allocation2] sm:$0xff]  ;;  %1089 = vmatpush1.bf16.msra.mxu1 %v1088_v43  ;;  %v630_v43 = vld [vmem:[#allocation9 + $0x40] sm:$0xff] }
 0x14d   : > { %1091 = vmatprep.subr.bf16.mxu1 %v1090_v48  ;;  %v373_v1 = vmul.f32 0.00390625, %v372_v55  ;;  %v629_v32 = vld [vmem:[#allocation9 + $0x38] sm:$0xff]  ;;  %v648_v48 = vld [vmem:[#allocation9 + $0xd0] sm:$0xff] }
 0x14e   : > { %v1108_v40 = vpack.c.bf16 %v629_v32, %v628_v31  ;;  %v632_v55 = vld [vmem:[#allocation9 + $0x50] sm:$0xff] }
 0x14f   : > { %1057 = vmatpush1.bf16.msra.mxu0 %v1056_v42  ;;  %v1110_v42 = vpack.c.bf16 %v647_v37, %v646_v36 }
 0x150   : > { %1059 = vmatprep.subr.bf16.mxu0 %v1058_v44  ;;  %1093 = vmatpush1.bf16.msra.mxu1 %v1092_v56  ;;  %v631_v44 = vld [vmem:[#allocation9 + $0x48] sm:$0xff]  ;;  %v633_v56 = vld [vmem:[#allocation9 + $0x58] sm:$0xff] }
 0x151   : > { %1127 = vmatprep.subr.bf16.mxu1 %v1126_v61  ;;  %v1112_v52 = vpack.c.bf16 %v631_v44, %v630_v43  ;;  %v1116_v60 = vpack.c.bf16 %v633_v56, %v632_v55  ;;  %v1148_v61 = vpack.c.bf16 %v665_v59, %v664_v58  ;;  %v955_v59 = vld [vmem:[%s1765_s5] ss:$0 sm:$0xff] }
 0x153   : > { %1061 = vmatpush1.bf16.msra.mxu0 %v1060_v54  ;;  %596 = vmatmul.mubr.f32.vlgmr.msra.gmra.mrb[0].mxu1 %v373_v1  ;;  %v1114_v54 = vpack.c.bf16 %v649_v49, %v648_v48  ;;  %v617_v48 = vld [vmem:[#allocation6 + $0x18] sm:$0xff] }
 0x154   : > { %1095 = vmatprep.subr.bf16.mxu0 %v1094_v57  ;;  %1129 = vmatpush3.bf16.msra.mxu1 %v1128_v5  ;;  %v1146_v57 = vpack.c.bf16 %v681_v51, %v680_v50  ;;  %v1150_v5 = vpack.c.bf16 %v683_v2, %v682_v0  ;;  %v616_v50 = vld [vmem:[#allocation6 + $0x10] sm:$0xff] }
 0x155   : > { %1131 = vmatprep.subr.bf16.mxu1 %v1130_v10  ;;  %v652_v10 = vld [vmem:[#allocation9 + $0xf0] sm:$0xff] }
 0x156   : > { %525 = vmatmul.mubr.f32.vlgmr.msra.gmra.mrb[0].mxu0 %v373_v1  ;;  %v1118_v1 = vpack.c.bf16 %v651_v63, %v650_v62  ;;  %v1122_v13 = vpack.c.bf16 %v653_v11, %v652_v10 }
 0x157   : > { %1097 = vmatpush3.bf16.msra.mxu0 %v1096_v4  ;;  %v635_v4 = vld [vmem:[#allocation9 + $0x68] sm:$0xff] }
 0x158   : > { %1099 = vmatprep.subr.bf16.mxu0 %v1098_v6  ;;  %1133 = vmatpush3.bf16.msra.mxu1 %v1132_v17  ;;  %v1120_v6 = vpack.c.bf16 %v635_v4, %v634_v3  ;;  %v637_v17 = vld [vmem:[#allocation9 + $0x78] sm:$0xff] }
 0x159   : > { %1135 = vmatprep.subr.bf16.mxu1 %v1134_v22  ;;  %v1124_v19 = vpack.c.bf16 %v637_v17, %v636_v15  ;;  %v440_v22 = vlaneseq }
 0x15b   : > { %1101 = vmatpush3.bf16.msra.mxu0 %v1100_v16  ;;  %v1154_v16 = vpack.c.bf16 %v685_v14, %v684_v12  ;;  %v441_v23 = vshrl.u32 %v440_v22, 7 }
 0x15c   : > { %1103 = vmatprep.subr.bf16.mxu0 %v1102_v18  ;;  %1137 = vmatpush3.bf16.msra.mxu1 %v1136_v29  ;;  %v668_v18 = vld [vmem:[#allocation9 + $0x170] sm:$0xff] }
 0x15d   : > { %1139 = vmatprep.subr.bf16.mxu1 %v1138_v34  ;;  %v1156_v21 = vpack.c.bf16 %v669_v20, %v668_v18  ;;  %v442_v24 = vsub.s32 0, %v441_v23  ;;  %v450_v26 = vsub.s32 2, %v441_v23  ;;  %v446_v27 = vsub.s32 1, %v441_v23 }
 0x15f   : > { %1105 = vmatpush3.bf16.msra.mxu0 %v1104_v28  ;;  %v454_v28 = vsub.s32 3, %v441_v23  ;;  %v443_v29 = vrot.slane %v438_v25, %v442_v24  ;;  %v447_v31 = vrot.slane %v438_v25, %v446_v27 }
 0x160   : > { %1107 = vmatprep.subr.bf16.mxu0 %v1106_v30  ;;  %1141 = vmatpush3.bf16.msra.mxu1 %v1140_v41  ;;  %v451_v30 = vrot.slane %v438_v25, %v450_v26 }
 0x161   : > { %1143 = vmatprep.subr.bf16.mxu1 %v1142_v46  ;;  %v455_v32 = vrot.slane %v438_v25, %v454_v28  ;;  %v614_v46 = vld [vmem:[#allocation6] sm:$0xff] }
 0x163   : > { %1109 = vmatpush3.bf16.msra.mxu0 %v1108_v40 }
 0x164   : > { %1111 = vmatprep.subr.bf16.mxu0 %v1110_v42  ;;  %1145 = vmatpush3.bf16.msra.mxu1 %v1144_v53  ;;  %v615_v42 = vld [vmem:[#allocation6 + $0x8] sm:$0xff] }
 0x165   : > { %1147 = vmatprep.subr.bf16.mxu1 %v1146_v57 }
 0x167   : > { %1113 = vmatpush3.bf16.msra.mxu0 %v1112_v52 }
 0x168   : > { %1115 = vmatprep.subr.bf16.mxu0 %v1114_v54  ;;  %1149 = vmatpush3.bf16.msra.mxu1 %v1148_v61 }
 0x169   : > { %1151 = vmatprep.subr.bf16.mxu1 %v1150_v5 }
 0x16b   : > { %1117 = vmatpush3.bf16.msra.mxu0 %v1116_v60 }
 0x16c   : > { %1119 = vmatprep.subr.bf16.mxu0 %v1118_v1  ;;  %1153 = vmatpush3.bf16.msra.mxu1 %v1152_v9 }
 0x16d   : > { %1155 = vmatprep.subr.bf16.mxu1 %v1154_v16 }
 0x16f   : > { %1121 = vmatpush3.bf16.msra.mxu0 %v1120_v6 }
 0x170   : > { %1123 = vmatprep.subr.bf16.mxu0 %v1122_v13  ;;  %1157 = vmatpush3.bf16.msra.mxu1 %v1156_v21 }
 0x173   : > { %1125 = vmatpush3.bf16.msra.mxu0 %v1124_v19 }
 0x226   : > { %v597_v35 = vpop.f32.mrb[0].mxu1 }
 0x227   : > { %v598_v37 = vadd.f32 %v597_v35, %v451_v30  ;;  %v599_v39 = vpop.f32.mrb[1].mxu1 }
 0x228   : > { %v600_v41 = vadd.f32 %v599_v39, %v455_v32 }
 0x229   : > { %v526_v33 = vpop.f32.mrb[0].mxu0  ;;  %vm604_vm5 = vcmp.ge.f32.partialorder %v598_v37, 0.0  ;;  %v608_v43 = vmul.f32 0.01, %v598_v37 }
 0x22a   : > { %v527_v34 = vadd.f32 %v526_v33, %v443_v29  ;;  %v528_v36 = vpop.f32.mrb[1].mxu0  ;;  %vm605_vm7 = vcmp.ge.f32.partialorder %v600_v41, 0.0  ;;  %v609_v47 = vmul.f32 0.01, %v600_v41 }
 0x22b   : > { %v529_v38 = vadd.f32 %v528_v36, %v447_v31  ;;  %v612_v49 = vsel %vm604_vm5, %v598_v37, %v608_v43 }
 0x22c   : > { %vm602_vm4 = vcmp.ge.f32.partialorder %v527_v34, 0.0  ;;  %v606_v40 = vmul.f32 0.01, %v527_v34  ;;  %v613_v53 = vsel %vm605_vm7, %v600_v41, %v609_v47  ;;  %v620_v56 = vmul.f32 %v616_v50, %v612_v49 }
 0x22d   : > { %vm603_vm6 = vcmp.ge.f32.partialorder %v529_v38, 0.0  ;;  %v607_v44 = vmul.f32 0.01, %v529_v38  ;;  %v621_v55 = vmul.f32 %v617_v48, %v613_v53 }
 0x22e   : > { %v610_v45 = vsel %vm602_vm4, %v527_v34, %v606_v40 }
 0x22f   : > { %v611_v51 = vsel %vm603_vm6, %v529_v38, %v607_v44  ;;  %v618_v54 = vmul.f32 %v614_v46, %v610_v45  ;;  %827 = vmatprep.mubr.f32.mxu1 %v621_v55 }
 0x230   : > { %v619_v52 = vmul.f32 %v615_v42, %v611_v51  ;;  %828 = vmatmul.mubr.f32.vlgmr.msra.gmra.mrb[2].mxu1 %v620_v56 }
 0x232   : > { %757 = vmatprep.mubr.f32.mxu0 %v619_v52 }
 0x233   : > { %758 = vmatmul.mubr.f32.vlgmr.msra.gmra.mrb[2].mxu0 %v618_v54 }
 0x303   : > { %v1027_v58 = vpop.f32.mrb[2].mxu1 }
 0x304   : > { %v1028_v62 = vpop.f32.mrb[3].mxu1 }
 0x305   : > { %v1029_v63 = vadd.f32 %v1028_v62, %v1027_v58 }
 0x306   : > { %v992_v57 = vpop.f32.mrb[2].mxu0 }
 0x307   : > { %v993_v60 = vpop.f32.mrb[3].mxu0 }
 0x308   : > { %v994_v61 = vadd.f32 %v993_v60, %v992_v57 }
 0x30a   : > { %v760_v0 = vadd.f32 %v994_v61, %v955_v59 }
 0x30c   : > { %v830_v1 = vadd.f32 %v1029_v63, %v760_v0 }
 0x30e   : > { %833 = vst [vmem:[#allocation11] sm:$0xff] %v830_v1 }
 0x30f PF: > { %s1785_s12 = sadd.s32 4294967295, %s1461_s26   ;;  %s1475_s9 = smov [#allocation11]  }
 0x310   : > { %p1716_p6 = scmp.eq.s32.totalorder %s1785_s12, 1  ;;  %s843_s8 = sshll.u32 %s1475_s9, 4  ;;  %s844_s8 = int_to_ptr.vmem [resolvable:$true] %s843_s8 }
 0x311   : > { %s1373_s1 = scalar_lea.vmem %s844_s8, 128  ;;  %p1380_p11 = scmp.lt.s32.totalorder %s844_s8, %s844_s8 }
 0x312   : > { %p1374_p9 = scmp.ne.s32.totalorder %s844_s8, %s1373_s1  ;;  %p1381_p13 = scmp.lt.s32.totalorder %s1373_s1, %s1373_s1 }
 0x314   : > { %p1375_p10 = pnand %p1374_p9, %p1716_p6  ;;  %p1382_p7 = por %p1381_p13, %p1380_p11 }
 0x316   : > { %p1376_p0 = pneg %p1375_p10 }
 0x318   : > { %p1383_p12 = pnand %p1382_p7, %p1376_p0 }
 0x31a   : > { %1386 = shalt.err (!%p1383_p12)
}
 0x31b   : > { %s1387_s15 = scalar_lea.hbm %s1766_s6, 128 }
 0x31c   : > { %p1388_p2 = scmp.ne.s32.totalorder %s1766_s6, %s1387_s15  ;;  %p1393_p4 = scmp.lt.u32.totalorder %s1387_s15, %s1766_s6 }
 0x31e   : > { %p1389_p3 = pnand %p1388_p2, %p1716_p6 }
 0x320   : > { %p1390_p8 = pneg %p1389_p3 }
 0x322   : > { %p1395_p1 = pnand %p1393_p4, %p1390_p8 }
 0x324   : > { %1398 = shalt.err (!%p1395_p1)
}
 0x325   : > { %1173 = dma.vmem_to_hbm [thread:$0]  (%p1716_p6), %s844_s8, 128, %s1766_s6, [#allocation5]  }
 0x326   : > { %1436 = dma.done.wait (%p1716_p6), [#allocation5], 128  }
 0x327   : > { %1438 = vsyncadd (%p1716_p6), [#allocation5], 4294967168 }
 0x328 PF: > { %s22_s26 = sadd.s32 1, %s1461_s26   ;;  %s1787_s21 = smov %s1445_s22 }
 0x329   : > { %p19_p5 = scmp.ge.s32.totalorder %s22_s26, 4   ;;  %s1788_s22 = smov %s1449_s23 }
 0x32a   : > { %s1789_s23 = smov %s1660_s11  ;;  %s1790_s24 = smov %s1457_s25 }
 0x32b   : > { %s1791_s25 = smov %s1793_s10  ;;  %21 = sbr.rel (!%p19_p5) target bundleno = 9 (0x9), region = 106 }
 0x332   :  { %856 = vsyncpa [#allocation4], 1 }
 0x333   :  { %858 = vsyncpa [#allocation4 + $0x1], 1 }
 0x334   :  { %859 = vsyncpa [#allocation7], 1 }
 0x335   :  { %860 = vsyncpa [#allocation10], 1 }
 0x336   :  { %861 = vsyncpa [#allocation5], 1 }
 0x337   :  { %863 = vsyncpa [#allocation5 + $0x1], 1 }

</bundles_post_ra>
